<compile_context>
chip_gen: v5e
topology: v5e:2x2
jax: 0.10.0
libtpu: 0.0.40
codegen_flags: <defaults>
</compile_context>

<pallas_src>
import jax
import jax.numpy as jnp
from jax import lax
from jax.experimental import pallas as pl
from jax.experimental.pallas import tpu as pltpu

BN_EPS = 1e-5
CHUNK_ROWS = 8          # rows processed per inner-loop step (one f32 vreg high)
MAX_TILE_ROWS = 512     # cap: 512 rows * 128 lanes = 65536 pixels per grid step
VMEM_BUDGET = 16 * 1024 * 1024  # conservative double-buffer budget (v5e/v6e/v7x)


def _spatial_attention_kernel(
    x1_ref, x2_ref,            # (C, TR, 128) VMEM, pixels dense on sublanes+lanes
    w1_ref, b1_ref,            # (C, C), (C,)  SMEM  (BN-scale-folded weight, bias)
    w2_ref, b2_ref,            # (C, C), (C,)  SMEM
    wl_ref, bl_ref,            # (C,),   (1,)  SMEM  (C -> 1 "layer" conv)
    o1_ref, o2_ref,            # (C, TR, 128) VMEM
):
    C, TR, _ = x1_ref.shape
    n_chunks = TR // CHUNK_ROWS

    # Hoist all scalar parameters out of the pixel loop (loop-invariant sregs).
    w1 = [[w1_ref[co, ci] for ci in range(C)] for co in range(C)]
    w2 = [[w2_ref[co, ci] for ci in range(C)] for co in range(C)]
    b1 = [b1_ref[co] for co in range(C)]
    b2 = [b2_ref[co] for co in range(C)]
    wl = [wl_ref[co] for co in range(C)]
    bl = bl_ref[0]

    def chunk_body(r, carry):
        row0 = pl.multiple_of(r * CHUNK_ROWS, CHUNK_ROWS)
        x1c = [x1_ref[ci, pl.ds(row0, CHUNK_ROWS), :] for ci in range(C)]
        x2c = [x2_ref[ci, pl.ds(row0, CHUNK_ROWS), :] for ci in range(C)]

        y1_rows, y2_rows = [], []
        z = None
        for co in range(C):
            a1 = x1c[0] * w1[co][0]
            a2 = x2c[0] * w2[co][0]
            for ci in range(1, C):
                a1 = a1 + x1c[ci] * w1[co][ci]
                a2 = a2 + x2c[ci] * w2[co][ci]
            y1 = jnp.maximum(a1 + b1[co], 0.0)      # conv1: 1x1 -> BN -> ReLU
            y2 = jnp.maximum(a2 + b2[co], 0.0)      # conv2: 1x1 -> BN -> ReLU
            y1_rows.append(y1)
            y2_rows.append(y2)
            s = jnp.maximum(y1 + y2, 0.0)           # relu(x1 + x2)
            contrib = s * wl[co]                    # layer 1x1 conv (C -> 1)
            z = contrib if z is None else z + contrib

        beta = jax.nn.sigmoid(jnp.maximum(z + bl, 0.0))   # layer BN -> ReLU -> sigmoid

        for co in range(C):
            o1_ref[co, pl.ds(row0, CHUNK_ROWS), :] = beta * y1_rows[co]
            o2_ref[co, pl.ds(row0, CHUNK_ROWS), :] = beta * y2_rows[co]
        return carry

    lax.fori_loop(0, n_chunks, chunk_body, 0)


def _plan_tiles(P, C):
    """Pad P to sublane-aligned rows of 128 lanes and pick a VMEM-sized row tile."""
    rows = pl.cdiv(P, 128)
    rows = ((rows + 7) // 8) * 8                       # sublane-align (multiple of 8)

    # 4 pixel arrays (x1, x2, o1, o2), each double-buffered, f32.
    bytes_per_row = C * 128 * 4
    budget_rows = max(CHUNK_ROWS, VMEM_BUDGET // (4 * 2 * bytes_per_row))
    budget_rows = (budget_rows // CHUNK_ROWS) * CHUNK_ROWS
    tile_rows = min(rows, MAX_TILE_ROWS, budget_rows)

    rows_padded = ((rows + tile_rows - 1) // tile_rows) * tile_rows
    return rows_padded, tile_rows


def make_params(key, in_channels):
    """Deterministic synthetic parameters: conv weights (cout, cin) + BN stats."""
    C = in_channels
    ks = jax.random.split(key, 6)

    def conv_w(k, cout, cin):
        return jax.random.normal(k, (cout, cin), jnp.float32) * 0.3

    def bn(k, c):
        k0, k1, k2, k3 = jax.random.split(k, 4)
        gamma = 1.0 + 0.1 * jax.random.normal(k0, (c,), jnp.float32)
        beta = 0.1 * jax.random.normal(k1, (c,), jnp.float32)
        mean = 0.1 * jax.random.normal(k2, (c,), jnp.float32)
        var = jnp.abs(jax.random.normal(k3, (c,), jnp.float32)) + 0.5
        scale = gamma / jnp.sqrt(var + BN_EPS)
        bias = beta - mean * scale
        return scale, bias

    w1 = conv_w(ks[0], C, C); s1, b1 = bn(ks[1], C)
    w2 = conv_w(ks[2], C, C); s2, b2 = bn(ks[3], C)
    wl = conv_w(ks[4], 1, C); sl, bl = bn(ks[5], 1)
    return dict(w1=w1, s1=s1, b1=b1, w2=w2, s2=s2, b2=b2, wl=wl, sl=sl, bl=bl)


@jax.jit
def spatial_attention(x1_nchw, x2_nchw, params):
    N, C, H, W = x1_nchw.shape
    P = H * W
    rows_padded, tile_rows = _plan_tiles(P, C)
    P_pad = rows_padded * 128

    # NCHW is already channels-major / pixels-last: reshape is free (no transpose).
    x1f = x1_nchw.reshape(N, C, P)
    x2f = x2_nchw.reshape(N, C, P)
    if P_pad > P:
        pad = ((0, 0), (0, 0), (0, P_pad - P))
        x1f = jnp.pad(x1f, pad)
        x2f = jnp.pad(x2f, pad)
    # Pixels on sublanes (rows) and lanes (128): dense vreg blocks in the kernel.
    x1f = x1f.reshape(N, C, rows_padded, 128)
    x2f = x2f.reshape(N, C, rows_padded, 128)

    # Fold BN scale into the conv weights (wrapper side); biases pass through.
    w1f = params["w1"] * params["s1"][:, None]                 # (C, C)
    w2f = params["w2"] * params["s2"][:, None]                 # (C, C)
    wlf = (params["wl"] * params["sl"][:, None]).reshape(C)    # (C,)
    b1f = params["b1"]                                         # (C,)
    b2f = params["b2"]                                         # (C,)
    blf = params["bl"].reshape(1)                              # (1,)

    xspec = pl.BlockSpec((None, C, tile_rows, 128), lambda n, p: (n, 0, p, 0))
    smem = pl.BlockSpec(memory_space=pltpu.MemorySpace.SMEM)

    out_sds = jax.ShapeDtypeStruct((N, C, rows_padded, 128), jnp.float32)

    o1f, o2f = pl.pallas_call(
        _spatial_attention_kernel,
        out_shape=(out_sds, out_sds),
        grid_spec=pltpu.PrefetchScalarGridSpec(
            num_scalar_prefetch=0,
            grid=(N, rows_padded // tile_rows),
            in_specs=[
                xspec, xspec,
                smem, smem,      # w1, b1
                smem, smem,      # w2, b2
                smem, smem,      # wl, bl
            ],
            out_specs=[xspec, xspec],
        ),
        compiler_params=pltpu.CompilerParams(
            dimension_semantics=("parallel", "parallel"),
        ),
    )(x1f, x2f, w1f, b1f, w2f, b2f, wlf, blf)

    o1f = o1f.reshape(N, C, P_pad)[:, :, :P].reshape(N, C, H, W)
    o2f = o2f.reshape(N, C, P_pad)[:, :, :P].reshape(N, C, H, W)
    return o1f, o2f


def _reference(x1, x2, p):
    """Plain-JAX NCHW reference mirroring the PyTorch forward (eval BN)."""
    def cba(x, w, s, b):
        y = jnp.einsum("oc,nchw->nohw", w, x)
        return jnp.maximum(y * s[None, :, None, None] + b[None, :, None, None], 0.0)

    y1 = cba(x1, p["w1"], p["s1"], p["b1"])
    y2 = cba(x2, p["w2"], p["s2"], p["b2"])
    s = jnp.maximum(y1 + y2, 0.0)
    z = cba(s, p["wl"], p["sl"], p["bl"])             # (N, 1, H, W)
    beta = jax.nn.sigmoid(z)
    return beta * y1, beta * y2


if __name__ == "__main__":
    key = jax.random.PRNGKey(0)
    k_x1, k_x2, k_p = jax.random.split(key, 3)

    N, C, H, W = 2, 4, 16, 16
    x1 = jax.random.normal(k_x1, (N, C, H, W), jnp.float32)
    x2 = jax.random.normal(k_x2, (N, C, H, W), jnp.float32)
    params = make_params(k_p, C)

    o1, o2 = spatial_attention(x1, x2, params)
    jax.block_until_ready((o1, o2))

    r1, r2 = _reference(x1, x2, params)
    assert o1.shape == (N, C, H, W) and o2.shape == (N, C, H, W)
    assert jnp.allclose(o1, r1, atol=1e-3, rtol=1e-3)
    assert jnp.allclose(o2, r2, atol=1e-3, rtol=1e-3)

    print("KERNEL_OK")
</pallas_src>

<mosaic_0001>
module attributes {stable_mosaic.version = 11 : i64} {
  func.func @_spatial_attention_kernel(%arg0: i32, %arg1: i32, %arg2: memref<1x4x8x128xf32, #tpu.memory_space<vmem>>, %arg3: memref<1x4x8x128xf32, #tpu.memory_space<vmem>>, %arg4: memref<4x4xf32, #tpu.memory_space<smem>>, %arg5: memref<4xf32, #tpu.memory_space<smem>>, %arg6: memref<4x4xf32, #tpu.memory_space<smem>>, %arg7: memref<4xf32, #tpu.memory_space<smem>>, %arg8: memref<4xf32, #tpu.memory_space<smem>>, %arg9: memref<1xf32, #tpu.memory_space<smem>>, %arg10: memref<1x4x8x128xf32, #tpu.memory_space<vmem>>, %arg11: memref<1x4x8x128xf32, #tpu.memory_space<vmem>>) attributes {dimension_semantics = [#tpu.dimension_semantics<parallel>, #tpu.dimension_semantics<parallel>], iteration_bounds = array<i64: 2, 1>, scalar_prefetch = 0 : i64, scratch_operands = 0 : i64, tpu.core_type = #tpu.core_type<tc>, window_params = [{transform_indices = @transform_0, window_bounds = array<i64: 1, 4, 8, 128>}, {transform_indices = @transform_1, window_bounds = array<i64: 1, 4, 8, 128>}, {transform_indices = @transform_2, window_bounds = array<i64: 4, 4>}, {transform_indices = @transform_3, window_bounds = array<i64: 4>}, {transform_indices = @transform_4, window_bounds = array<i64: 4, 4>}, {transform_indices = @transform_5, window_bounds = array<i64: 4>}, {transform_indices = @transform_6, window_bounds = array<i64: 4>}, {transform_indices = @transform_7, window_bounds = array<i64: 1>}, {transform_indices = @transform_8, window_bounds = array<i64: 1, 4, 8, 128>}, {transform_indices = @transform_9, window_bounds = array<i64: 1, 4, 8, 128>}]} {
    %c0 = arith.constant 0 : index
    %c0_0 = arith.constant 0 : index
    %0 = memref.load %arg4[%c0, %c0_0] : memref<4x4xf32, #tpu.memory_space<smem>>
    %c0_1 = arith.constant 0 : index
    %c1 = arith.constant 1 : index
    %1 = memref.load %arg4[%c0_1, %c1] : memref<4x4xf32, #tpu.memory_space<smem>>
    %c0_2 = arith.constant 0 : index
    %c2 = arith.constant 2 : index
    %2 = memref.load %arg4[%c0_2, %c2] : memref<4x4xf32, #tpu.memory_space<smem>>
    %c0_3 = arith.constant 0 : index
    %c3 = arith.constant 3 : index
    %3 = memref.load %arg4[%c0_3, %c3] : memref<4x4xf32, #tpu.memory_space<smem>>
    %c1_4 = arith.constant 1 : index
    %c0_5 = arith.constant 0 : index
    %4 = memref.load %arg4[%c1_4, %c0_5] : memref<4x4xf32, #tpu.memory_space<smem>>
    %c1_6 = arith.constant 1 : index
    %c1_7 = arith.constant 1 : index
    %5 = memref.load %arg4[%c1_6, %c1_7] : memref<4x4xf32, #tpu.memory_space<smem>>
    %c1_8 = arith.constant 1 : index
    %c2_9 = arith.constant 2 : index
    %6 = memref.load %arg4[%c1_8, %c2_9] : memref<4x4xf32, #tpu.memory_space<smem>>
    %c1_10 = arith.constant 1 : index
    %c3_11 = arith.constant 3 : index
    %7 = memref.load %arg4[%c1_10, %c3_11] : memref<4x4xf32, #tpu.memory_space<smem>>
    %c2_12 = arith.constant 2 : index
    %c0_13 = arith.constant 0 : index
    %8 = memref.load %arg4[%c2_12, %c0_13] : memref<4x4xf32, #tpu.memory_space<smem>>
    %c2_14 = arith.constant 2 : index
    %c1_15 = arith.constant 1 : index
    %9 = memref.load %arg4[%c2_14, %c1_15] : memref<4x4xf32, #tpu.memory_space<smem>>
    %c2_16 = arith.constant 2 : index
    %c2_17 = arith.constant 2 : index
    %10 = memref.load %arg4[%c2_16, %c2_17] : memref<4x4xf32, #tpu.memory_space<smem>>
    %c2_18 = arith.constant 2 : index
    %c3_19 = arith.constant 3 : index
    %11 = memref.load %arg4[%c2_18, %c3_19] : memref<4x4xf32, #tpu.memory_space<smem>>
    %c3_20 = arith.constant 3 : index
    %c0_21 = arith.constant 0 : index
    %12 = memref.load %arg4[%c3_20, %c0_21] : memref<4x4xf32, #tpu.memory_space<smem>>
    %c3_22 = arith.constant 3 : index
    %c1_23 = arith.constant 1 : index
    %13 = memref.load %arg4[%c3_22, %c1_23] : memref<4x4xf32, #tpu.memory_space<smem>>
    %c3_24 = arith.constant 3 : index
    %c2_25 = arith.constant 2 : index
    %14 = memref.load %arg4[%c3_24, %c2_25] : memref<4x4xf32, #tpu.memory_space<smem>>
    %c3_26 = arith.constant 3 : index
    %c3_27 = arith.constant 3 : index
    %15 = memref.load %arg4[%c3_26, %c3_27] : memref<4x4xf32, #tpu.memory_space<smem>>
    %c0_28 = arith.constant 0 : index
    %c0_29 = arith.constant 0 : index
    %16 = memref.load %arg6[%c0_28, %c0_29] : memref<4x4xf32, #tpu.memory_space<smem>>
    %c0_30 = arith.constant 0 : index
    %c1_31 = arith.constant 1 : index
    %17 = memref.load %arg6[%c0_30, %c1_31] : memref<4x4xf32, #tpu.memory_space<smem>>
    %c0_32 = arith.constant 0 : index
    %c2_33 = arith.constant 2 : index
    %18 = memref.load %arg6[%c0_32, %c2_33] : memref<4x4xf32, #tpu.memory_space<smem>>
    %c0_34 = arith.constant 0 : index
    %c3_35 = arith.constant 3 : index
    %19 = memref.load %arg6[%c0_34, %c3_35] : memref<4x4xf32, #tpu.memory_space<smem>>
    %c1_36 = arith.constant 1 : index
    %c0_37 = arith.constant 0 : index
    %20 = memref.load %arg6[%c1_36, %c0_37] : memref<4x4xf32, #tpu.memory_space<smem>>
    %c1_38 = arith.constant 1 : index
    %c1_39 = arith.constant 1 : index
    %21 = memref.load %arg6[%c1_38, %c1_39] : memref<4x4xf32, #tpu.memory_space<smem>>
    %c1_40 = arith.constant 1 : index
    %c2_41 = arith.constant 2 : index
    %22 = memref.load %arg6[%c1_40, %c2_41] : memref<4x4xf32, #tpu.memory_space<smem>>
    %c1_42 = arith.constant 1 : index
    %c3_43 = arith.constant 3 : index
    %23 = memref.load %arg6[%c1_42, %c3_43] : memref<4x4xf32, #tpu.memory_space<smem>>
    %c2_44 = arith.constant 2 : index
    %c0_45 = arith.constant 0 : index
    %24 = memref.load %arg6[%c2_44, %c0_45] : memref<4x4xf32, #tpu.memory_space<smem>>
    %c2_46 = arith.constant 2 : index
    %c1_47 = arith.constant 1 : index
    %25 = memref.load %arg6[%c2_46, %c1_47] : memref<4x4xf32, #tpu.memory_space<smem>>
    %c2_48 = arith.constant 2 : index
    %c2_49 = arith.constant 2 : index
    %26 = memref.load %arg6[%c2_48, %c2_49] : memref<4x4xf32, #tpu.memory_space<smem>>
    %c2_50 = arith.constant 2 : index
    %c3_51 = arith.constant 3 : index
    %27 = memref.load %arg6[%c2_50, %c3_51] : memref<4x4xf32, #tpu.memory_space<smem>>
    %c3_52 = arith.constant 3 : index
    %c0_53 = arith.constant 0 : index
    %28 = memref.load %arg6[%c3_52, %c0_53] : memref<4x4xf32, #tpu.memory_space<smem>>
    %c3_54 = arith.constant 3 : index
    %c1_55 = arith.constant 1 : index
    %29 = memref.load %arg6[%c3_54, %c1_55] : memref<4x4xf32, #tpu.memory_space<smem>>
    %c3_56 = arith.constant 3 : index
    %c2_57 = arith.constant 2 : index
    %30 = memref.load %arg6[%c3_56, %c2_57] : memref<4x4xf32, #tpu.memory_space<smem>>
    %c3_58 = arith.constant 3 : index
    %c3_59 = arith.constant 3 : index
    %31 = memref.load %arg6[%c3_58, %c3_59] : memref<4x4xf32, #tpu.memory_space<smem>>
    %c0_60 = arith.constant 0 : index
    %32 = memref.load %arg5[%c0_60] : memref<4xf32, #tpu.memory_space<smem>>
    %c1_61 = arith.constant 1 : index
    %33 = memref.load %arg5[%c1_61] : memref<4xf32, #tpu.memory_space<smem>>
    %c2_62 = arith.constant 2 : index
    %34 = memref.load %arg5[%c2_62] : memref<4xf32, #tpu.memory_space<smem>>
    %c3_63 = arith.constant 3 : index
    %35 = memref.load %arg5[%c3_63] : memref<4xf32, #tpu.memory_space<smem>>
    %c0_64 = arith.constant 0 : index
    %36 = memref.load %arg7[%c0_64] : memref<4xf32, #tpu.memory_space<smem>>
    %c1_65 = arith.constant 1 : index
    %37 = memref.load %arg7[%c1_65] : memref<4xf32, #tpu.memory_space<smem>>
    %c2_66 = arith.constant 2 : index
    %38 = memref.load %arg7[%c2_66] : memref<4xf32, #tpu.memory_space<smem>>
    %c3_67 = arith.constant 3 : index
    %39 = memref.load %arg7[%c3_67] : memref<4xf32, #tpu.memory_space<smem>>
    %c0_68 = arith.constant 0 : index
    %40 = memref.load %arg8[%c0_68] : memref<4xf32, #tpu.memory_space<smem>>
    %c1_69 = arith.constant 1 : index
    %41 = memref.load %arg8[%c1_69] : memref<4xf32, #tpu.memory_space<smem>>
    %c2_70 = arith.constant 2 : index
    %42 = memref.load %arg8[%c2_70] : memref<4xf32, #tpu.memory_space<smem>>
    %c3_71 = arith.constant 3 : index
    %43 = memref.load %arg8[%c3_71] : memref<4xf32, #tpu.memory_space<smem>>
    %c0_72 = arith.constant 0 : index
    %44 = memref.load %arg9[%c0_72] : memref<1xf32, #tpu.memory_space<smem>>
    %c0_i32 = arith.constant 0 : i32
    %c8_i32 = arith.constant 8 : i32
    %45 = arith.muli %c0_i32, %c8_i32 : i32
    %46 = tpu.assume_multiple %45, 8 : i32
    %c0_73 = arith.constant 0 : index
    %c0_74 = arith.constant 0 : index
    %47 = arith.index_cast %46 : i32 to index
    %c0_75 = arith.constant 0 : index
    %48 = vector.load %arg2[%c0_73, %c0_74, %47, %c0_75] : memref<1x4x8x128xf32, #tpu.memory_space<vmem>>, vector<1x1x8x128xf32>
    %49 = vector.shape_cast %48 : vector<1x1x8x128xf32> to vector<8x128xf32>
    %c0_76 = arith.constant 0 : index
    %c1_77 = arith.constant 1 : index
    %50 = arith.index_cast %46 : i32 to index
    %c0_78 = arith.constant 0 : index
    %51 = vector.load %arg2[%c0_76, %c1_77, %50, %c0_78] : memref<1x4x8x128xf32, #tpu.memory_space<vmem>>, vector<1x1x8x128xf32>
    %52 = vector.shape_cast %51 : vector<1x1x8x128xf32> to vector<8x128xf32>
    %c0_79 = arith.constant 0 : index
    %c2_80 = arith.constant 2 : index
    %53 = arith.index_cast %46 : i32 to index
    %c0_81 = arith.constant 0 : index
    %54 = vector.load %arg2[%c0_79, %c2_80, %53, %c0_81] : memref<1x4x8x128xf32, #tpu.memory_space<vmem>>, vector<1x1x8x128xf32>
    %55 = vector.shape_cast %54 : vector<1x1x8x128xf32> to vector<8x128xf32>
    %c0_82 = arith.constant 0 : index
    %c3_83 = arith.constant 3 : index
    %56 = arith.index_cast %46 : i32 to index
    %c0_84 = arith.constant 0 : index
    %57 = vector.load %arg2[%c0_82, %c3_83, %56, %c0_84] : memref<1x4x8x128xf32, #tpu.memory_space<vmem>>, vector<1x1x8x128xf32>
    %58 = vector.shape_cast %57 : vector<1x1x8x128xf32> to vector<8x128xf32>
    %c0_85 = arith.constant 0 : index
    %c0_86 = arith.constant 0 : index
    %59 = arith.index_cast %46 : i32 to index
    %c0_87 = arith.constant 0 : index
    %60 = vector.load %arg3[%c0_85, %c0_86, %59, %c0_87] : memref<1x4x8x128xf32, #tpu.memory_space<vmem>>, vector<1x1x8x128xf32>
    %61 = vector.shape_cast %60 : vector<1x1x8x128xf32> to vector<8x128xf32>
    %c0_88 = arith.constant 0 : index
    %c1_89 = arith.constant 1 : index
    %62 = arith.index_cast %46 : i32 to index
    %c0_90 = arith.constant 0 : index
    %63 = vector.load %arg3[%c0_88, %c1_89, %62, %c0_90] : memref<1x4x8x128xf32, #tpu.memory_space<vmem>>, vector<1x1x8x128xf32>
    %64 = vector.shape_cast %63 : vector<1x1x8x128xf32> to vector<8x128xf32>
    %c0_91 = arith.constant 0 : index
    %c2_92 = arith.constant 2 : index
    %65 = arith.index_cast %46 : i32 to index
    %c0_93 = arith.constant 0 : index
    %66 = vector.load %arg3[%c0_91, %c2_92, %65, %c0_93] : memref<1x4x8x128xf32, #tpu.memory_space<vmem>>, vector<1x1x8x128xf32>
    %67 = vector.shape_cast %66 : vector<1x1x8x128xf32> to vector<8x128xf32>
    %c0_94 = arith.constant 0 : index
    %c3_95 = arith.constant 3 : index
    %68 = arith.index_cast %46 : i32 to index
    %c0_96 = arith.constant 0 : index
    %69 = vector.load %arg3[%c0_94, %c3_95, %68, %c0_96] : memref<1x4x8x128xf32, #tpu.memory_space<vmem>>, vector<1x1x8x128xf32>
    %70 = vector.shape_cast %69 : vector<1x1x8x128xf32> to vector<8x128xf32>
    %71 = vector.broadcast %0 : f32 to vector<8x128xf32>
    %72 = arith.mulf %49, %71 : vector<8x128xf32>
    %73 = vector.broadcast %16 : f32 to vector<8x128xf32>
    %74 = arith.mulf %61, %73 : vector<8x128xf32>
    %75 = vector.broadcast %1 : f32 to vector<8x128xf32>
    %76 = arith.mulf %52, %75 : vector<8x128xf32>
    %77 = arith.addf %72, %76 : vector<8x128xf32>
    %78 = vector.broadcast %17 : f32 to vector<8x128xf32>
    %79 = arith.mulf %64, %78 : vector<8x128xf32>
    %80 = arith.addf %74, %79 : vector<8x128xf32>
    %81 = vector.broadcast %2 : f32 to vector<8x128xf32>
    %82 = arith.mulf %55, %81 : vector<8x128xf32>
    %83 = arith.addf %77, %82 : vector<8x128xf32>
    %84 = vector.broadcast %18 : f32 to vector<8x128xf32>
    %85 = arith.mulf %67, %84 : vector<8x128xf32>
    %86 = arith.addf %80, %85 : vector<8x128xf32>
    %87 = vector.broadcast %3 : f32 to vector<8x128xf32>
    %88 = arith.mulf %58, %87 : vector<8x128xf32>
    %89 = arith.addf %83, %88 : vector<8x128xf32>
    %90 = vector.broadcast %19 : f32 to vector<8x128xf32>
    %91 = arith.mulf %70, %90 : vector<8x128xf32>
    %92 = arith.addf %86, %91 : vector<8x128xf32>
    %93 = vector.broadcast %32 : f32 to vector<8x128xf32>
    %94 = arith.addf %89, %93 : vector<8x128xf32>
    %cst = arith.constant 0.000000e+00 : f32
    %95 = vector.broadcast %cst : f32 to vector<8x128xf32>
    %96 = arith.maximumf %94, %95 : vector<8x128xf32>
    %97 = vector.broadcast %36 : f32 to vector<8x128xf32>
    %98 = arith.addf %92, %97 : vector<8x128xf32>
    %cst_97 = arith.constant 0.000000e+00 : f32
    %99 = vector.broadcast %cst_97 : f32 to vector<8x128xf32>
    %100 = arith.maximumf %98, %99 : vector<8x128xf32>
    %101 = arith.addf %96, %100 : vector<8x128xf32>
    %cst_98 = arith.constant 0.000000e+00 : f32
    %102 = vector.broadcast %cst_98 : f32 to vector<8x128xf32>
    %103 = arith.maximumf %101, %102 : vector<8x128xf32>
    %104 = vector.broadcast %40 : f32 to vector<8x128xf32>
    %105 = arith.mulf %103, %104 : vector<8x128xf32>
    %106 = vector.broadcast %4 : f32 to vector<8x128xf32>
    %107 = arith.mulf %49, %106 : vector<8x128xf32>
    %108 = vector.broadcast %20 : f32 to vector<8x128xf32>
    %109 = arith.mulf %61, %108 : vector<8x128xf32>
    %110 = vector.broadcast %5 : f32 to vector<8x128xf32>
    %111 = arith.mulf %52, %110 : vector<8x128xf32>
    %112 = arith.addf %107, %111 : vector<8x128xf32>
    %113 = vector.broadcast %21 : f32 to vector<8x128xf32>
    %114 = arith.mulf %64, %113 : vector<8x128xf32>
    %115 = arith.addf %109, %114 : vector<8x128xf32>
    %116 = vector.broadcast %6 : f32 to vector<8x128xf32>
    %117 = arith.mulf %55, %116 : vector<8x128xf32>
    %118 = arith.addf %112, %117 : vector<8x128xf32>
    %119 = vector.broadcast %22 : f32 to vector<8x128xf32>
    %120 = arith.mulf %67, %119 : vector<8x128xf32>
    %121 = arith.addf %115, %120 : vector<8x128xf32>
    %122 = vector.broadcast %7 : f32 to vector<8x128xf32>
    %123 = arith.mulf %58, %122 : vector<8x128xf32>
    %124 = arith.addf %118, %123 : vector<8x128xf32>
    %125 = vector.broadcast %23 : f32 to vector<8x128xf32>
    %126 = arith.mulf %70, %125 : vector<8x128xf32>
    %127 = arith.addf %121, %126 : vector<8x128xf32>
    %128 = vector.broadcast %33 : f32 to vector<8x128xf32>
    %129 = arith.addf %124, %128 : vector<8x128xf32>
    %cst_99 = arith.constant 0.000000e+00 : f32
    %130 = vector.broadcast %cst_99 : f32 to vector<8x128xf32>
    %131 = arith.maximumf %129, %130 : vector<8x128xf32>
    %132 = vector.broadcast %37 : f32 to vector<8x128xf32>
    %133 = arith.addf %127, %132 : vector<8x128xf32>
    %cst_100 = arith.constant 0.000000e+00 : f32
    %134 = vector.broadcast %cst_100 : f32 to vector<8x128xf32>
    %135 = arith.maximumf %133, %134 : vector<8x128xf32>
    %136 = arith.addf %131, %135 : vector<8x128xf32>
    %cst_101 = arith.constant 0.000000e+00 : f32
    %137 = vector.broadcast %cst_101 : f32 to vector<8x128xf32>
    %138 = arith.maximumf %136, %137 : vector<8x128xf32>
    %139 = vector.broadcast %41 : f32 to vector<8x128xf32>
    %140 = arith.mulf %138, %139 : vector<8x128xf32>
    %141 = arith.addf %105, %140 : vector<8x128xf32>
    %142 = vector.broadcast %8 : f32 to vector<8x128xf32>
    %143 = arith.mulf %49, %142 : vector<8x128xf32>
    %144 = vector.broadcast %24 : f32 to vector<8x128xf32>
    %145 = arith.mulf %61, %144 : vector<8x128xf32>
    %146 = vector.broadcast %9 : f32 to vector<8x128xf32>
    %147 = arith.mulf %52, %146 : vector<8x128xf32>
    %148 = arith.addf %143, %147 : vector<8x128xf32>
    %149 = vector.broadcast %25 : f32 to vector<8x128xf32>
    %150 = arith.mulf %64, %149 : vector<8x128xf32>
    %151 = arith.addf %145, %150 : vector<8x128xf32>
    %152 = vector.broadcast %10 : f32 to vector<8x128xf32>
    %153 = arith.mulf %55, %152 : vector<8x128xf32>
    %154 = arith.addf %148, %153 : vector<8x128xf32>
    %155 = vector.broadcast %26 : f32 to vector<8x128xf32>
    %156 = arith.mulf %67, %155 : vector<8x128xf32>
    %157 = arith.addf %151, %156 : vector<8x128xf32>
    %158 = vector.broadcast %11 : f32 to vector<8x128xf32>
    %159 = arith.mulf %58, %158 : vector<8x128xf32>
    %160 = arith.addf %154, %159 : vector<8x128xf32>
    %161 = vector.broadcast %27 : f32 to vector<8x128xf32>
    %162 = arith.mulf %70, %161 : vector<8x128xf32>
    %163 = arith.addf %157, %162 : vector<8x128xf32>
    %164 = vector.broadcast %34 : f32 to vector<8x128xf32>
    %165 = arith.addf %160, %164 : vector<8x128xf32>
    %cst_102 = arith.constant 0.000000e+00 : f32
    %166 = vector.broadcast %cst_102 : f32 to vector<8x128xf32>
    %167 = arith.maximumf %165, %166 : vector<8x128xf32>
    %168 = vector.broadcast %38 : f32 to vector<8x128xf32>
    %169 = arith.addf %163, %168 : vector<8x128xf32>
    %cst_103 = arith.constant 0.000000e+00 : f32
    %170 = vector.broadcast %cst_103 : f32 to vector<8x128xf32>
    %171 = arith.maximumf %169, %170 : vector<8x128xf32>
    %172 = arith.addf %167, %171 : vector<8x128xf32>
    %cst_104 = arith.constant 0.000000e+00 : f32
    %173 = vector.broadcast %cst_104 : f32 to vector<8x128xf32>
    %174 = arith.maximumf %172, %173 : vector<8x128xf32>
    %175 = vector.broadcast %42 : f32 to vector<8x128xf32>
    %176 = arith.mulf %174, %175 : vector<8x128xf32>
    %177 = arith.addf %141, %176 : vector<8x128xf32>
    %178 = vector.broadcast %12 : f32 to vector<8x128xf32>
    %179 = arith.mulf %49, %178 : vector<8x128xf32>
    %180 = vector.broadcast %28 : f32 to vector<8x128xf32>
    %181 = arith.mulf %61, %180 : vector<8x128xf32>
    %182 = vector.broadcast %13 : f32 to vector<8x128xf32>
    %183 = arith.mulf %52, %182 : vector<8x128xf32>
    %184 = arith.addf %179, %183 : vector<8x128xf32>
    %185 = vector.broadcast %29 : f32 to vector<8x128xf32>
    %186 = arith.mulf %64, %185 : vector<8x128xf32>
    %187 = arith.addf %181, %186 : vector<8x128xf32>
    %188 = vector.broadcast %14 : f32 to vector<8x128xf32>
    %189 = arith.mulf %55, %188 : vector<8x128xf32>
    %190 = arith.addf %184, %189 : vector<8x128xf32>
    %191 = vector.broadcast %30 : f32 to vector<8x128xf32>
    %192 = arith.mulf %67, %191 : vector<8x128xf32>
    %193 = arith.addf %187, %192 : vector<8x128xf32>
    %194 = vector.broadcast %15 : f32 to vector<8x128xf32>
    %195 = arith.mulf %58, %194 : vector<8x128xf32>
    %196 = arith.addf %190, %195 : vector<8x128xf32>
    %197 = vector.broadcast %31 : f32 to vector<8x128xf32>
    %198 = arith.mulf %70, %197 : vector<8x128xf32>
    %199 = arith.addf %193, %198 : vector<8x128xf32>
    %200 = vector.broadcast %35 : f32 to vector<8x128xf32>
    %201 = arith.addf %196, %200 : vector<8x128xf32>
    %cst_105 = arith.constant 0.000000e+00 : f32
    %202 = vector.broadcast %cst_105 : f32 to vector<8x128xf32>
    %203 = arith.maximumf %201, %202 : vector<8x128xf32>
    %204 = vector.broadcast %39 : f32 to vector<8x128xf32>
    %205 = arith.addf %199, %204 : vector<8x128xf32>
    %cst_106 = arith.constant 0.000000e+00 : f32
    %206 = vector.broadcast %cst_106 : f32 to vector<8x128xf32>
    %207 = arith.maximumf %205, %206 : vector<8x128xf32>
    %208 = arith.addf %203, %207 : vector<8x128xf32>
    %cst_107 = arith.constant 0.000000e+00 : f32
    %209 = vector.broadcast %cst_107 : f32 to vector<8x128xf32>
    %210 = arith.maximumf %208, %209 : vector<8x128xf32>
    %211 = vector.broadcast %43 : f32 to vector<8x128xf32>
    %212 = arith.mulf %210, %211 : vector<8x128xf32>
    %213 = arith.addf %177, %212 : vector<8x128xf32>
    %214 = vector.broadcast %44 : f32 to vector<8x128xf32>
    %215 = arith.addf %213, %214 : vector<8x128xf32>
    %cst_108 = arith.constant 0.000000e+00 : f32
    %216 = vector.broadcast %cst_108 : f32 to vector<8x128xf32>
    %217 = arith.maximumf %215, %216 : vector<8x128xf32>
    %218 = arith.negf %217 : vector<8x128xf32>
    %219 = math.exp %218 : vector<8x128xf32>
    %cst_109 = arith.constant 1.000000e+00 : f32
    %220 = vector.broadcast %cst_109 : f32 to vector<8x128xf32>
    %221 = arith.addf %220, %219 : vector<8x128xf32>
    %222 = arith.divf %220, %221 : vector<8x128xf32>
    %223 = arith.mulf %222, %96 : vector<8x128xf32>
    %c0_110 = arith.constant 0 : index
    %c0_111 = arith.constant 0 : index
    %224 = arith.index_cast %46 : i32 to index
    %c0_112 = arith.constant 0 : index
    %225 = vector.load %arg10[%c0_110, %c0_111, %224, %c0_112] : memref<1x4x8x128xf32, #tpu.memory_space<vmem>>, vector<1x1x8x128xf32>
    %226 = vector.shape_cast %225 : vector<1x1x8x128xf32> to vector<8x128xf32>
    %227 = vector.shape_cast %223 : vector<8x128xf32> to vector<1x1x8x128xf32>
    tpu.vector_store %arg10[%c0_110, %c0_111, %224, %c0_112], %227 {strides = array<i32>} : memref<1x4x8x128xf32, #tpu.memory_space<vmem>>, vector<1x1x8x128xf32>,
    %228 = arith.mulf %222, %100 : vector<8x128xf32>
    %c0_113 = arith.constant 0 : index
    %c0_114 = arith.constant 0 : index
    %229 = arith.index_cast %46 : i32 to index
    %c0_115 = arith.constant 0 : index
    %230 = vector.load %arg11[%c0_113, %c0_114, %229, %c0_115] : memref<1x4x8x128xf32, #tpu.memory_space<vmem>>, vector<1x1x8x128xf32>
    %231 = vector.shape_cast %230 : vector<1x1x8x128xf32> to vector<8x128xf32>
    %232 = vector.shape_cast %228 : vector<8x128xf32> to vector<1x1x8x128xf32>
    tpu.vector_store %arg11[%c0_113, %c0_114, %229, %c0_115], %232 {strides = array<i32>} : memref<1x4x8x128xf32, #tpu.memory_space<vmem>>, vector<1x1x8x128xf32>,
    %233 = arith.mulf %222, %131 : vector<8x128xf32>
    %c0_116 = arith.constant 0 : index
    %c1_117 = arith.constant 1 : index
    %234 = arith.index_cast %46 : i32 to index
    %c0_118 = arith.constant 0 : index
    %235 = vector.load %arg10[%c0_116, %c1_117, %234, %c0_118] : memref<1x4x8x128xf32, #tpu.memory_space<vmem>>, vector<1x1x8x128xf32>
    %236 = vector.shape_cast %235 : vector<1x1x8x128xf32> to vector<8x128xf32>
    %237 = vector.shape_cast %233 : vector<8x128xf32> to vector<1x1x8x128xf32>
    tpu.vector_store %arg10[%c0_116, %c1_117, %234, %c0_118], %237 {strides = array<i32>} : memref<1x4x8x128xf32, #tpu.memory_space<vmem>>, vector<1x1x8x128xf32>,
    %238 = arith.mulf %222, %135 : vector<8x128xf32>
    %c0_119 = arith.constant 0 : index
    %c1_120 = arith.constant 1 : index
    %239 = arith.index_cast %46 : i32 to index
    %c0_121 = arith.constant 0 : index
    %240 = vector.load %arg11[%c0_119, %c1_120, %239, %c0_121] : memref<1x4x8x128xf32, #tpu.memory_space<vmem>>, vector<1x1x8x128xf32>
    %241 = vector.shape_cast %240 : vector<1x1x8x128xf32> to vector<8x128xf32>
    %242 = vector.shape_cast %238 : vector<8x128xf32> to vector<1x1x8x128xf32>
    tpu.vector_store %arg11[%c0_119, %c1_120, %239, %c0_121], %242 {strides = array<i32>} : memref<1x4x8x128xf32, #tpu.memory_space<vmem>>, vector<1x1x8x128xf32>,
    %243 = arith.mulf %222, %167 : vector<8x128xf32>
    %c0_122 = arith.constant 0 : index
    %c2_123 = arith.constant 2 : index
    %244 = arith.index_cast %46 : i32 to index
    %c0_124 = arith.constant 0 : index
    %245 = vector.load %arg10[%c0_122, %c2_123, %244, %c0_124] : memref<1x4x8x128xf32, #tpu.memory_space<vmem>>, vector<1x1x8x128xf32>
    %246 = vector.shape_cast %245 : vector<1x1x8x128xf32> to vector<8x128xf32>
    %247 = vector.shape_cast %243 : vector<8x128xf32> to vector<1x1x8x128xf32>
    tpu.vector_store %arg10[%c0_122, %c2_123, %244, %c0_124], %247 {strides = array<i32>} : memref<1x4x8x128xf32, #tpu.memory_space<vmem>>, vector<1x1x8x128xf32>,
    %248 = arith.mulf %222, %171 : vector<8x128xf32>
    %c0_125 = arith.constant 0 : index
    %c2_126 = arith.constant 2 : index
    %249 = arith.index_cast %46 : i32 to index
    %c0_127 = arith.constant 0 : index
    %250 = vector.load %arg11[%c0_125, %c2_126, %249, %c0_127] : memref<1x4x8x128xf32, #tpu.memory_space<vmem>>, vector<1x1x8x128xf32>
    %251 = vector.shape_cast %250 : vector<1x1x8x128xf32> to vector<8x128xf32>
    %252 = vector.shape_cast %248 : vector<8x128xf32> to vector<1x1x8x128xf32>
    tpu.vector_store %arg11[%c0_125, %c2_126, %249, %c0_127], %252 {strides = array<i32>} : memref<1x4x8x128xf32, #tpu.memory_space<vmem>>, vector<1x1x8x128xf32>,
    %253 = arith.mulf %222, %203 : vector<8x128xf32>
    %c0_128 = arith.constant 0 : index
    %c3_129 = arith.constant 3 : index
    %254 = arith.index_cast %46 : i32 to index
    %c0_130 = arith.constant 0 : index
    %255 = vector.load %arg10[%c0_128, %c3_129, %254, %c0_130] : memref<1x4x8x128xf32, #tpu.memory_space<vmem>>, vector<1x1x8x128xf32>
    %256 = vector.shape_cast %255 : vector<1x1x8x128xf32> to vector<8x128xf32>
    %257 = vector.shape_cast %253 : vector<8x128xf32> to vector<1x1x8x128xf32>
    tpu.vector_store %arg10[%c0_128, %c3_129, %254, %c0_130], %257 {strides = array<i32>} : memref<1x4x8x128xf32, #tpu.memory_space<vmem>>, vector<1x1x8x128xf32>,
    %258 = arith.mulf %222, %207 : vector<8x128xf32>
    %c0_131 = arith.constant 0 : index
    %c3_132 = arith.constant 3 : index
    %259 = arith.index_cast %46 : i32 to index
    %c0_133 = arith.constant 0 : index
    %260 = vector.load %arg11[%c0_131, %c3_132, %259, %c0_133] : memref<1x4x8x128xf32, #tpu.memory_space<vmem>>, vector<1x1x8x128xf32>
    %261 = vector.shape_cast %260 : vector<1x1x8x128xf32> to vector<8x128xf32>
    %262 = vector.shape_cast %258 : vector<8x128xf32> to vector<1x1x8x128xf32>
    tpu.vector_store %arg11[%c0_131, %c3_132, %259, %c0_133], %262 {strides = array<i32>} : memref<1x4x8x128xf32, #tpu.memory_space<vmem>>, vector<1x1x8x128xf32>,
    %c1_i32 = arith.constant 1 : i32
    return
  }
  func.func @transform_0(%arg0: i32, %arg1: i32) -> (i32, i32, i32, i32) {
    %c0_i32 = arith.constant 0 : i32
    %c0_i32_0 = arith.constant 0 : i32
    %c0_i32_1 = arith.constant 0 : i32
    return %arg0, %c0_i32, %arg1, %c0_i32_0 : i32, i32, i32, i32
  }
  func.func @transform_1(%arg0: i32, %arg1: i32) -> (i32, i32, i32, i32) {
    %c0_i32 = arith.constant 0 : i32
    %c0_i32_0 = arith.constant 0 : i32
    %c0_i32_1 = arith.constant 0 : i32
    return %arg0, %c0_i32, %arg1, %c0_i32_0 : i32, i32, i32, i32
  }
  func.func @transform_2(%arg0: i32, %arg1: i32) -> (i32, i32) {
    %c0_i32 = arith.constant 0 : i32
    %c0_i32_0 = arith.constant 0 : i32
    %c0_i32_1 = arith.constant 0 : i32
    return %c0_i32, %c0_i32_0 : i32, i32
  }
  func.func @transform_3(%arg0: i32, %arg1: i32) -> i32 {
    %c0_i32 = arith.constant 0 : i32
    %c0_i32_0 = arith.constant 0 : i32
    return %c0_i32 : i32
  }
  func.func @transform_4(%arg0: i32, %arg1: i32) -> (i32, i32) {
    %c0_i32 = arith.constant 0 : i32
    %c0_i32_0 = arith.constant 0 : i32
    %c0_i32_1 = arith.constant 0 : i32
    return %c0_i32, %c0_i32_0 : i32, i32
  }
  func.func @transform_5(%arg0: i32, %arg1: i32) -> i32 {
    %c0_i32 = arith.constant 0 : i32
    %c0_i32_0 = arith.constant 0 : i32
    return %c0_i32 : i32
  }
  func.func @transform_6(%arg0: i32, %arg1: i32) -> i32 {
    %c0_i32 = arith.constant 0 : i32
    %c0_i32_0 = arith.constant 0 : i32
    return %c0_i32 : i32
  }
  func.func @transform_7(%arg0: i32, %arg1: i32) -> i32 {
    %c0_i32 = arith.constant 0 : i32
    %c0_i32_0 = arith.constant 0 : i32
    return %c0_i32 : i32
  }
  func.func @transform_8(%arg0: i32, %arg1: i32) -> (i32, i32, i32, i32) {
    %c0_i32 = arith.constant 0 : i32
    %c0_i32_0 = arith.constant 0 : i32
    %c0_i32_1 = arith.constant 0 : i32
    return %arg0, %c0_i32, %arg1, %c0_i32_0 : i32, i32, i32, i32
  }
  func.func @transform_9(%arg0: i32, %arg1: i32) -> (i32, i32, i32, i32) {
    %c0_i32 = arith.constant 0 : i32
    %c0_i32_0 = arith.constant 0 : i32
    %c0_i32_1 = arith.constant 0 : i32
    return %arg0, %c0_i32, %arg1, %c0_i32_0 : i32, i32, i32, i32
  }
}

</mosaic_0001>

<bundles_post_ra>
// kernel: spatial_attention.1
= control target key start
LH: loop header
LB: loop body
LE: loop exit
PB: predicated region body
PF: predicated region fallthrough
CT: control target
= control target key end

     0   :  { %s1510_s0 = inlined_call_operand.vmem [shape: f32[2,4,8,128], index: 0, kind: input, shape index: {}]   ;;  %s1511_s1 = inlined_call_operand.vmem [shape: f32[2,4,8,128], index: 1, kind: input, shape index: {}]   ;;  %s1512_s2 = inlined_call_operand.vmem [shape: f32[4,4], index: 2, kind: input, shape index: {}]   ;;  %s1513_s3 = inlined_call_operand.vmem [shape: f32[4], index: 3, kind: input, shape index: {}]   ;;  %s1514_s4 = inlined_call_operand.vmem [shape: f32[4,4], index: 4, kind: input, shape index: {}]   ;;  %s1515_s5 = inlined_call_operand.vmem [shape: f32[4], index: 5, kind: input, shape index: {}]   ;;  %s1516_s6 = inlined_call_operand.vmem [shape: f32[4], index: 6, kind: input, shape index: {}]   ;;  %s1517_s7 = inlined_call_operand.<no memory space> [shape: f32[1], index: 7, kind: input, shape index: {}]   ;;  %s1518_s8 = inlined_call_operand.vmem [shape: f32[2,4,8,128], index: 8, kind: output, shape index: {0}]   ;;  %s1519_s9 = inlined_call_operand.vmem [shape: f32[2,4,8,128], index: 9, kind: output, shape index: {1}]  }
   0x1   :  { %1520 = sst [smem:[#allocation14_spill]] %s1510_s0 }
   0x2   :  { %15 = sst [smem:[#allocation2]] %s1517_s7 }
   0x3   :  { %16 = vsyncpa [#allocation4], 0 }
   0x4   :  { %17 = vsyncpa [#allocation6], 0 }
   0x5   :  { %18 = vsyncpa [#allocation9], 0  ;;  %s1258_s11 = smov 0   ;;  %s1260_s12 = smov 0  }
   0x6   :  { %s1262_s13 = smov 0  }
   0x7 LB: > { %s301_s15 = sshll.u32 %s1513_s3, 4  ;;  %s929_s16 = sadd.s32 4294967295, %s1198_s13   ;;  %s1198_s13 = sphi %s1262_s13, %s24_s13   ;;  %s1194_s12 = sphi %s1260_s12, %s1526_s12   ;;  %s1190_s11 = sphi %s1258_s11, %s1525_s11   ;;  %s302_s15 = int_to_ptr.vmem [resolvable:$true] %s301_s15 }
   0x8   : > { %p931_p0 = scmp.ge.s32.totalorder %s1198_s13, 1  ;;  %p279_p1 = scmp.lt.s32.totalorder %s1198_s13, 3 }
   0x9   : > { %p1279_p2 = scmp.eq.s32.totalorder %s929_s16, 0  ;;  %s321_s21 = sshll.u32 %s1515_s5, 4  ;;  %s322_s21 = int_to_ptr.vmem [resolvable:$true] %s321_s21 }
   0xa   : > { %p1283_p3 = pnand %p931_p0, %p279_p1  ;;  %s36_s23 = sadd.s32 1, %s1194_s12 }
   0xb   : > { %s291_s26 = sshll.u32 %s1512_s2, 4  ;;  %p38_p6 = scmp.ge.s32.totalorder %s36_s23, 2  ;;  %s292_s26 = int_to_ptr.vmem [resolvable:$true] %s291_s26 }
   0xc   : > { %p1030_p4 = pneg %p1283_p3  ;;  %s1200_s27 = smov [#allocation5]  }
   0xd   : > { %s1201_s28 = smov [#allocation8]   ;;  %s1528_s23 = smov (%p38_p6, %s36_s23), 0 }
   0xe   : > { %p1294_p5 = pnand %p1279_p2, %p1030_p4  ;;  %s1202_s29 = smov [#allocation3]  }
   0xf   : > { %s311_s7 = sshll.u32 %s1514_s4, 4  ;;  %s331_s19 = sshll.u32 %s1516_s6, 4  ;;  %s312_s7 = int_to_ptr.vmem [resolvable:$true] %s311_s7  ;;  %s332_s19 = int_to_ptr.vmem [resolvable:$true] %s331_s19 }
  0x10   : > { %1036 = dma.vmem_to_smem (!%p1294_p5), %s302_s15, 16, %s1200_s27, [#allocation6]  }
  0x11   : > { %1042 = dma.vmem_to_smem (!%p1294_p5), %s322_s21, 16, %s1201_s28, [#allocation9]  }
  0x12   : > { %1033 = dma.vmem_to_smem (!%p1294_p5), %s292_s26, 64, %s1202_s29, [#allocation4]  }
  0x13   : > { %s1203_s20 = smov [#allocation7]   ;;  %s1204_s15 = smov [#allocation10]  }
  0x14   : > { %1039 = dma.vmem_to_smem (!%p1294_p5), %s312_s7, 64, %s1203_s20, [#allocation6]  }
  0x15   : > { %1045 = dma.vmem_to_smem (!%p1294_p5), %s332_s19, 16, %s1204_s15, [#allocation9]  }
  0x16   : > { %369 = sbr.rel (%p1283_p3) target bundleno = 137 (0x89), region = 52 }
  0x1b   : > { %1177 = dma.done.wait (%p1279_p2), [#allocation4], 64  }
  0x1c   : > { %1179 = vsyncadd (%p1279_p2), [#allocation4], 4294967232 }
  0x1d   : > { %1181 = dma.done.wait (%p1279_p2), [#allocation6], 80  }
  0x1e   : > { %1183 = vsyncadd (%p1279_p2), [#allocation6], 4294967216 }
  0x1f   : > { %1185 = dma.done.wait (%p1279_p2), [#allocation9], 32  }
  0x20   : > { %1187 = vsyncadd (%p1279_p2), [#allocation9], 4294967264 }
  0x21   : > { %396 = sfence }
  0x22   : > { %p449_p7 = scmp.lt.s32.totalorder %s1190_s11, 1  ;;  %s481_s18 = sld [smem:[#allocation3]] }
  0x23   : > { %s952_s21 = sld [smem:[#allocation3 + $0x1]] }
  0x24   : > { %s1530_s11 = smov (!%p449_p7, %s1190_s11), 1  ;;  %s1336_s22 = sld [smem:[#allocation3 + $0x2]] }
  0x25   : > { %s1338_s24 = sld [smem:[#allocation3 + $0x3]]  ;;  %s1340_s27 = sshll.u32 %s1530_s11, 5 }
  0x26   : > { %s955_s25 = sld [smem:[#allocation3 + $0x80]] }
  0x27   : > { %s956_s26 = sld [smem:[#allocation3 + $0x81]] }
  0x28   : > { %s1342_s28 = sld [smem:[#allocation3 + $0x82]]  ;;  %v543_v2 = vstv %s481_s18 }
  0x29   : > { %s1344_s17 = sld [smem:[#allocation3 + $0x83]]  ;;  %v547_v3 = vstv %s952_s21 }
  0x2a   : > { %s1346_s29 = sld [smem:[#allocation3 + $0x100]]  ;;  %v553_v9 = vstv %s1336_s22 }
  0x2b   : > { %s1524_s0 = sld [smem:[#allocation14_spill]]  ;;  %v559_v18 = vstv %s1338_s24 }
  0x2c   : > { %s1352_s14 = sld [smem:[#allocation3 + $0x101]]  ;;  %v575_v4 = vstv %s955_s25 }
  0x2d   : > { %s1354_s16 = sld [smem:[#allocation3 + $0x102]]  ;;  %v579_v5 = vstv %s956_s26 }
  0x2e   : > { %s1356_s19 = sld [smem:[#allocation3 + $0x103]]  ;;  %v585_v12 = vstv %s1342_s28 }
  0x2f   : > { %s1358_s11 = sld [smem:[#allocation3 + $0x180]]  ;;  %v591_v21 = vstv %s1344_s17 }
  0x30   : > { %s1360_s20 = sld [smem:[#allocation3 + $0x181]]  ;;  %v608_v13 = vstv %s1346_s29  ;;  %s1387_s29 = scalar_lea.vmem %s1511_s1, %s1340_s27 }
  0x31   : > { %s456_s7 = scalar_lea.vmem %s1524_s0, %s1340_s27  ;;  %s1362_s15 = sld [smem:[#allocation3 + $0x182]]  ;;  %v536_v29 = vld [vmem:[%s1387_s29] sm:$0xff]  ;;  %v1404_v30 = vld [vmem:[%s1387_s29 + $0x8] sm:$0xff]  ;;  %v995_v42 = vld [vmem:[%s1387_s29 + $0x10] sm:$0xff] }
  0x32   : > { %v526_v0 = vld [vmem:[%s456_s7] sm:$0xff]  ;;  %v991_v1 = vld [vmem:[%s456_s7 + $0x8] sm:$0xff]  ;;  %s1364_s30 = sld [smem:[#allocation3 + $0x183]]  ;;  %v992_v8 = vld [vmem:[%s456_s7 + $0x10] sm:$0xff]  ;;  %v612_v14 = vstv %s1352_s14 }
  0x33   : > { %v544_v6 = vmul.f32 %v543_v2, %v526_v0  ;;  %v548_v7 = vmul.f32 %v991_v1, %v547_v3  ;;  %s1366_s10 = sld [smem:[#allocation7]]  ;;  %v576_v10 = vmul.f32 %v575_v4, %v526_v0  ;;  %v580_v11 = vmul.f32 %v991_v1, %v579_v5  ;;  %v1380_v17 = vld [vmem:[%s456_s7 + $0x18] sm:$0xff] }
  0x34   : > { %s1369_s18 = sld [smem:[#allocation7 + $0x1]]  ;;  %v554_v16 = vmul.f32 %v992_v8, %v553_v9  ;;  %v586_v20 = vmul.f32 %v992_v8, %v585_v12  ;;  %v609_v22 = vmul.f32 %v608_v13, %v526_v0  ;;  %v613_v23 = vmul.f32 %v991_v1, %v612_v14  ;;  %v996_v63 = vld [vmem:[%s1387_s29 + $0x18] sm:$0xff] }
  0x35   : > { %s1372_s21 = sld [smem:[#allocation7 + $0x2]]  ;;  %v549_v15 = vadd.f32 %v548_v7, %v544_v6  ;;  %v581_v19 = vadd.f32 %v580_v11, %v576_v10  ;;  %v618_v24 = vstv %s1354_s16  ;;  %v560_v26 = vmul.f32 %v1380_v17, %v559_v18 }
  0x36   : > { %s1376_s25 = sld [smem:[#allocation7 + $0x3]]  ;;  %v641_v27 = vstv %s1358_s11  ;;  %v645_v28 = vstv %s1360_s20  ;;  %v592_v34 = vmul.f32 %v1380_v17, %v591_v21  ;;  %v614_v35 = vadd.f32 %v613_v23, %v609_v22 }
  0x37   : > { %s1378_s26 = sld [smem:[#allocation7 + $0x80]]  ;;  %v555_v25 = vadd.f32 %v554_v16, %v549_v15  ;;  %v587_v33 = vadd.f32 %v586_v20, %v581_v19  ;;  %v619_v36 = vmul.f32 %v992_v8, %v618_v24  ;;  %v624_v37 = vstv %s1356_s19 }
  0x38   : > { %s1389_s14 = sld [smem:[#allocation7 + $0x81]]  ;;  %v642_v39 = vmul.f32 %v641_v27, %v526_v0  ;;  %v646_v40 = vmul.f32 %v991_v1, %v645_v28  ;;  %v651_v41 = vstv %s1362_s15  ;;  %v625_v53 = vmul.f32 %v1380_v17, %v624_v37 }
  0x39   : > { %s1392_s0 = sld [smem:[#allocation7 + $0x82]]  ;;  %v545_v31 = vstv %s1366_s10  ;;  %v561_v47 = vadd.f32 %v560_v26, %v555_v25  ;;  %v593_v50 = vadd.f32 %v592_v34, %v587_v33  ;;  %v620_v52 = vadd.f32 %v619_v36, %v614_v35 }
  0x3a   : > { %s1395_s24 = sld [smem:[#allocation7 + $0x83]]  ;;  %v550_v32 = vstv %s1369_s18  ;;  %v546_v43 = vmul.f32 %v545_v31, %v536_v29  ;;  %v652_v54 = vmul.f32 %v992_v8, %v651_v41  ;;  %v647_v57 = vadd.f32 %v646_v40, %v642_v39 }
  0x3b   : > { %s1400_s7 = sld [smem:[#allocation7 + $0x100]]  ;;  %v551_v44 = vmul.f32 %v1404_v30, %v550_v32  ;;  %v556_v45 = vstv %s1372_s21  ;;  %v657_v58 = vstv %s1364_s30  ;;  %v626_v6 = vadd.f32 %v625_v53, %v620_v52 }
  0x3c   : > { %s1409_s17 = sld [smem:[#allocation7 + $0x101]]  ;;  %v557_v55 = vmul.f32 %v995_v42, %v556_v45  ;;  %v562_v60 = vstv %s1376_s25  ;;  %v658_v7 = vmul.f32 %v1380_v17, %v657_v58  ;;  %v653_v11 = vadd.f32 %v652_v54, %v647_v57 }
  0x3d   : > { %s1412_s16 = sld [smem:[#allocation7 + $0x102]]  ;;  %v577_v38 = vstv %s1378_s26  ;;  %v552_v59 = vadd.f32 %v551_v44, %v546_v43  ;;  %v563_v13 = vmul.f32 %v996_v63, %v562_v60 }
  0x3e   : > { %s1416_s11 = sld [smem:[#allocation7 + $0x103]]  ;;  %v582_v46 = vstv %s1389_s14  ;;  %v578_v48 = vmul.f32 %v577_v38, %v536_v29  ;;  %v659_v26 = vadd.f32 %v658_v7, %v653_v11 }
  0x3f   : > { %s1422_s20 = sld [smem:[#allocation7 + $0x180]]  ;;  %v583_v49 = vmul.f32 %v1404_v30, %v582_v46  ;;  %v588_v51 = vstv %s1392_s0  ;;  %v558_v12 = vadd.f32 %v557_v55, %v552_v59 }
  0x40   : > { %s1425_s19 = sld [smem:[#allocation7 + $0x181]]  ;;  %v589_v1 = vmul.f32 %v995_v42, %v588_v51  ;;  %v594_v4 = vstv %s1395_s24 }
  0x41   : > { %s1429_s15 = sld [smem:[#allocation7 + $0x182]]  ;;  %v610_v56 = vstv %s1400_s7  ;;  %v584_v0 = vadd.f32 %v583_v49, %v578_v48  ;;  %v595_v18 = vmul.f32 %v996_v63, %v594_v4  ;;  %v564_v28 = vadd.f32 %v563_v13, %v558_v12 }
  0x42   : > { %s1433_s10 = sld [smem:[#allocation7 + $0x183]]  ;;  %v611_v61 = vmul.f32 %v610_v56, %v536_v29  ;;  %v615_v62 = vstv %s1409_s17 }
  0x43   : > { %s1437_s0 = sld [smem:[#allocation5]]  ;;  %v616_v2 = vmul.f32 %v1404_v30, %v615_v62  ;;  %v621_v3 = vstv %s1412_s16  ;;  %v590_v16 = vadd.f32 %v589_v1, %v584_v0 }
  0x44   : > { %s1442_s18 = sld [smem:[#allocation5 + $0x1]]  ;;  %v622_v5 = vmul.f32 %v995_v42, %v621_v3  ;;  %v627_v9 = vstv %s1416_s11 }
  0x45   : > { %s1446_s30 = sld [smem:[#allocation5 + $0x2]]  ;;  %v617_v8 = vadd.f32 %v616_v2, %v611_v61  ;;  %v643_v10 = vstv %s1422_s20  ;;  %v628_v21 = vmul.f32 %v996_v63, %v627_v9  ;;  %v596_v31 = vadd.f32 %v595_v18, %v590_v16  ;;  %s472_s20 = scalar_lea.vmem %s1518_s8, %s1340_s27 }
  0x46   : > { %s1450_s21 = sld [smem:[#allocation5 + $0x3]]  ;;  %v644_v14 = vmul.f32 %v643_v10, %v536_v29  ;;  %v648_v15 = vstv %s1425_s19 }
  0x47   : > { %s1453_s25 = sld [smem:[#allocation8]]  ;;  %v649_v17 = vmul.f32 %v1404_v30, %v648_v15  ;;  %v654_v19 = vstv %s1429_s15  ;;  %v623_v20 = vadd.f32 %v622_v5, %v617_v8 }
  0x48   : > { %s1457_s26 = sld [smem:[#allocation8 + $0x1]]  ;;  %v655_v22 = vmul.f32 %v995_v42, %v654_v19  ;;  %v660_v23 = vstv %s1433_s10  ;;  %s480_s10 = scalar_lea.vmem %s1519_s9, %s1340_s27 }
  0x49   : > { %s1460_s22 = sld [smem:[#allocation8 + $0x2]]  ;;  %v565_v24 = vstv %s1437_s0  ;;  %v650_v25 = vadd.f32 %v649_v17, %v644_v14  ;;  %v661_v27 = vmul.f32 %v996_v63, %v660_v23  ;;  %v629_v35 = vadd.f32 %v628_v21, %v623_v20 }
  0x4a   : > { %s987_s28 = sld [smem:[#allocation8 + $0x3]]  ;;  %v1463_v29 = vadd.f32 %v565_v24, %v561_v47  ;;  %v597_v30 = vstv %s1442_s18 }
  0x4b   : > { %s1466_s29 = sld [smem:[#allocation10]]  ;;  %v1468_v32 = vadd.f32 %v597_v30, %v593_v50  ;;  %v630_v33 = vstv %s1446_s30  ;;  %v656_v34 = vadd.f32 %v655_v22, %v650_v25 }
  0x4c   : > { %s1471_s14 = sld [smem:[#allocation10 + $0x1]]  ;;  %v1473_v36 = vadd.f32 %v630_v33, %v626_v6  ;;  %v663_v37 = vstv %s1450_s21  ;;  %v567_v41 = vmax.f32 %v1463_v29, 0.0 }
  0x4d   : > { %s1476_s24 = sld [smem:[#allocation10 + $0x2]]  ;;  %v568_v38 = vstv %s1453_s25  ;;  %v662_v39 = vadd.f32 %v661_v27, %v656_v34  ;;  %v1479_v40 = vadd.f32 %v663_v37, %v659_v26  ;;  %v599_v44 = vmax.f32 %v1468_v32, 0.0 }
  0x4e   : > { %s1481_s7 = sld [smem:[#allocation10 + $0x3]]  ;;  %v569_v42 = vadd.f32 %v568_v38, %v564_v28  ;;  %v600_v43 = vstv %s1457_s26  ;;  %v632_v48 = vmax.f32 %v1473_v36, 0.0 }
  0x4f   : > { %v601_v45 = vadd.f32 %v600_v43, %v596_v31  ;;  %v633_v46 = vstv %s1460_s22  ;;  %v665_v52 = vmax.f32 %v1479_v40, 0.0  ;;  %s525_s17 = sld [smem:[#allocation2]] }
  0x50   : > { %v570_v47 = vmax.f32 %v569_v42, 0.0  ;;  %v634_v49 = vadd.f32 %v633_v46, %v629_v35  ;;  %v666_v50 = vstv %s987_s28 }
  0x51   : > { %v602_v51 = vmax.f32 %v601_v45, 0.0  ;;  %v667_v53 = vadd.f32 %v666_v50, %v662_v39  ;;  %v573_v56 = vstv %s1466_s29 }
  0x52   : > { %v571_v54 = vadd.f32 %v570_v47, %v567_v41  ;;  %v635_v55 = vmax.f32 %v634_v49, 0.0  ;;  %v605_v60 = vstv %s1471_s14 }
  0x53   : > { %v603_v57 = vadd.f32 %v602_v51, %v599_v44  ;;  %v668_v58 = vmax.f32 %v667_v53, 0.0  ;;  %v638_v63 = vstv %s1476_s24 }
  0x54   : > { %v572_v59 = vmax.f32 %v571_v54, 0.0  ;;  %v636_v61 = vadd.f32 %v635_v55, %v632_v48  ;;  %v671_v3 = vstv %s1481_s7 }
  0x55   : > { %v604_v62 = vmax.f32 %v603_v57, 0.0  ;;  %v669_v0 = vadd.f32 %v668_v58, %v665_v52  ;;  %v674_v10 = vstv %s525_s17 }
  0x56   : > { %v574_v1 = vmul.f32 %v573_v56, %v572_v59  ;;  %v637_v2 = vmax.f32 %v636_v61, 0.0 }
  0x57   : > { %v606_v4 = vmul.f32 %v605_v60, %v604_v62  ;;  %v670_v5 = vmax.f32 %v669_v0, 0.0 }
  0x58   : > { %v639_v6 = vmul.f32 %v638_v63, %v637_v2 }
  0x59   : > { %v607_v7 = vadd.f32 %v606_v4, %v574_v1  ;;  %v672_v8 = vmul.f32 %v671_v3, %v670_v5 }
  0x5b   : > { %v640_v9 = vadd.f32 %v639_v6, %v607_v7 }
  0x5d   : > { %v673_v11 = vadd.f32 %v672_v8, %v640_v9 }
  0x5f   : > { %v675_v12 = vadd.f32 %v674_v10, %v673_v11 }
  0x61   : > { %v676_v13 = vmax.f32 %v675_v12, 0.0 }
  0x63   : > { %v997_v14 = vmul.f32 -1.442695, %v676_v13 }
  0x65   : > { %1085 = vpow2.f32 %v997_v14 }
  0x6b   : > { %v1086_v15 = vpop.eup %1085 }
  0x6c   : > { %v680_v16 = vadd.f32 1.0, %v1086_v15 }
  0x6e   : > { %1087 = vrcp.f32 %v680_v16  ;;  %v692_v19 = vand.u32 2147483648, %v680_v16  ;;  %vm686_vm0 = vweird.f32 %v680_v16  ;;  %v690_v21 = vand.u32 2147483647, %v680_v16 }
  0x70   : > { %v693_v23 = vor.u32 1.1754944e-38, %v692_v19  ;;  %vm691_vm3 = vcmp.eq.f32.partialorder %v690_v21, 8.507059e+37 }
  0x74   : > { %v1088_v18 = vpop.eup %1087 }
  0x75   : > { %v682_v17 = vmul.f32 %v1088_v18, %v680_v16  ;;  %vm687_vm1 = vweird.f32 %v1088_v18 }
  0x76   : > { %vm688_vm2 = vmor %vm686_vm0, %vm687_vm1 }
  0x77   : > { %v683_v20 = vsub.f32 1.0, %v682_v17 }
  0x79   : > { %v684_v22 = vmul.f32 %v1088_v18, %v683_v20 }
  0x7b   : > { %v685_v24 = vadd.f32 %v1088_v18, %v684_v22 }
  0x7d   : > { %v689_v25 = vsel %vm688_vm2, %v1088_v18, %v685_v24 }
  0x7e   : > { %v694_v26 = vsel %vm691_vm3, %v693_v23, %v689_v25 }
  0x7f   : > { %v696_v27 = vmul.f32 %v694_v26, %v567_v41  ;;  %v698_v28 = vmul.f32 %v694_v26, %v570_v47  ;;  %v700_v29 = vmul.f32 %v694_v26, %v599_v44  ;;  %v703_v30 = vmul.f32 %v694_v26, %v602_v51 }
  0x80   : > { %v706_v31 = vmul.f32 %v694_v26, %v632_v48  ;;  %v709_v32 = vmul.f32 %v694_v26, %v635_v55  ;;  %v712_v33 = vmul.f32 %v694_v26, %v665_v52  ;;  %v715_v34 = vmul.f32 %v694_v26, %v668_v58 }
  0x81   : > { %697 = vst [vmem:[%s472_s20] sm:$0xff] %v696_v27 }
  0x82   : > { %699 = vst [vmem:[%s480_s10] sm:$0xff] %v698_v28 }
  0x83   : > { %998 = vst [vmem:[%s472_s20 + $0x8] sm:$0xff] %v700_v29 }
  0x84   : > { %999 = vst [vmem:[%s480_s10 + $0x8] sm:$0xff] %v703_v30 }
  0x85   : > { %1000 = vst [vmem:[%s472_s20 + $0x10] sm:$0xff] %v706_v31 }
  0x86   : > { %1001 = vst [vmem:[%s480_s10 + $0x10] sm:$0xff] %v709_v32 }
  0x87   : > { %1002 = vst [vmem:[%s472_s20 + $0x18] sm:$0xff] %v712_v33 }
  0x88   : > { %1003 = vst [vmem:[%s480_s10 + $0x18] sm:$0xff] %v715_v34 }
  0x89 PF: > { %s24_s13 = sadd.s32 1, %s1198_s13   ;;  %s1525_s11 = smov %s1194_s12 }
  0x8a   : > { %p21_p8 = scmp.ge.s32.totalorder %s24_s13, 4   ;;  %s1526_s12 = smov %s1528_s23 }
  0x8c   :  { %23 = sbr.rel (!%p21_p8) target bundleno = 7 (0x7), region = 130 }
  0x91   :  { %767 = vsyncpa [#allocation4], 1 }
  0x92   :  { %769 = vsyncpa [#allocation4 + $0x1], 1 }
  0x93   :  { %770 = vsyncpa [#allocation6], 1 }
  0x94   :  { %771 = vsyncpa [#allocation9], 1 }

</bundles_post_ra>
